<compile_context>
chip_gen: v7x
topology: tpu7x:2x2x1
jax: 0.10.0
libtpu: 0.0.40
codegen_flags: <defaults>
</compile_context>

<pallas_src>
import functools

import jax
import jax.numpy as jnp
from jax.experimental import pallas as pl
from jax.experimental.pallas import tpu as pltpu

EPSILON = 0.1
IGNORE_INDEX = -100

# Allowance (in f32 tile-copies) for Mosaic's elementwise temporaries
# (y, y_f32, exp(y), class_ids iota, select result, ...) when bounding tile_n.
_F32_TMP_COPIES = 6


def _ls_ce_partial_kernel(preds_ref, target_ref, out_ref, *, n_valid, ignore_index):
    """Per-row-tile partial sums.

    Writes a lane-dense (1, 1, 128) row:
      lane 0: sum_i ( -sum_c log_softmax(x)[i, c] )  over valid (non-pad) rows
      lane 1: sum_i ( -log_softmax(x)[i, t_i] )      over rows with t_i != ignore_index
    """
    i = pl.program_id(0)

    x = preds_ref[...]                                       # (TN, C) native dtype
    tn, c = x.shape

    # Single shifted tile y = x - rowmax; everything below derives from y so raw
    # x is dead after this point (sum_x fold: one fewer pass, fewer live temps).
    # Elementwise math stays in the input dtype (bf16 packed on v6e/v7x).
    row_max = jnp.max(x, axis=-1, keepdims=True)             # (TN, 1)
    y = x - row_max                                          # (TN, C), <= 0

    # log-sum-exp of the shifted rows: exp/log on the EUP, f32 accumulation.
    lse = jnp.log(jnp.sum(jnp.exp(y.astype(jnp.float32)),
                          axis=-1, keepdims=True))           # (TN, 1) f32

    # Mask rows that are out of range (global row id >= n_valid); the last grid
    # block may read past the (unpadded) preds array, those rows are garbage.
    row_ids = i * tn + jax.lax.broadcasted_iota(jnp.int32, (tn, 1), 0)
    row_valid = row_ids < n_valid                            # (TN, 1)

    # Smoothing term per row: -sum_c log_softmax(x) = C*lse - sum_c y.
    sum_y = jnp.sum(y, axis=-1, keepdims=True, dtype=jnp.float32)
    smooth_rows = jnp.where(row_valid, jnp.float32(c) * lse - sum_y, 0.0)

    # NLL term per row: -log_softmax(x)[i, t_i] = lse - y[i, t_i];
    # skip ignore_index and out-of-range rows.
    tgt = target_ref[...]                                    # (TN, 1) int32
    class_ids = jax.lax.broadcasted_iota(jnp.int32, (tn, c), 1)
    y_t = jnp.sum(jnp.where(class_ids == tgt, y, 0.0),
                  axis=-1, keepdims=True, dtype=jnp.float32)
    nll_valid = jnp.logical_and(row_valid, tgt != ignore_index)
    nll_rows = jnp.where(nll_valid, lse - y_t, 0.0)

    smooth_p = jnp.sum(smooth_rows)                          # scalar tile partial
    nll_p = jnp.sum(nll_rows)

    lane = jax.lax.broadcasted_iota(jnp.int32, (1, 128), 1)
    out_ref[0] = (jnp.where(lane == 0, smooth_p, 0.0)
                  + jnp.where(lane == 1, nll_p, 0.0))


def _vmem_capacity_bytes():
    try:
        info = pltpu.get_tpu_info()
        cap = getattr(info, "vmem_capacity_bytes", None)
        if cap:
            return int(cap)
    except Exception:
        pass
    return 64 << 20   # conservative fallback (v7x-sized VMEM)


def label_smoothing_cross_entropy(preds, target, *, epsilon=EPSILON,
                                  ignore_index=IGNORE_INDEX, tile_bytes=None):
    """preds: (N, C) float; target: (N,) int. Returns scalar f32 loss."""
    n, c = preds.shape
    elt = preds.dtype.itemsize

    # Per-generation byte budgets: 128 MiB-VMEM parts (v5e/v6e) get bigger tiles
    # and a higher scoped limit; v7x (64 MiB) stays moderate with headroom.
    vmem_cap = _vmem_capacity_bytes()
    big_vmem = vmem_cap >= (96 << 20)
    if tile_bytes is None:
        tile_bytes = (8 << 20) if big_vmem else (4 << 20)
    vmem_budget = (100 << 20) if big_vmem else (44 << 20)

    # Tile sizing:
    #  - HBM amortization: preds block ~= tile_bytes (no fixed row cap).
    #  - VMEM fit: double-buffered preds + double-buffered lane-padded target
    #    blocks (512 B/row resident) + f32 elementwise temporaries.
    resident_row_bytes = 2 * c * elt + 2 * 512 + _F32_TMP_COPIES * c * 4
    rows_by_tile = (tile_bytes // (c * elt)) // 8 * 8
    rows_by_vmem = ((vmem_budget - (6 << 20)) // resident_row_bytes) // 8 * 8
    n_rounded = ((n + 7) // 8) * 8
    tile_n = int(max(8, min(n_rounded, rows_by_tile, rows_by_vmem)))

    # Guarantee >= 2 row blocks when there is enough work so the "parallel"
    # grid axis can be split across v7x's two TensorCores (no-op on v5e/v6e).
    if tile_n >= n_rounded and n_rounded > 8:
        tile_n = max(8, ((n_rounded // 2 + 7) // 8) * 8)

    num_blocks = int(pl.cdiv(n, tile_n))
    n_pad = num_blocks * tile_n

    # Pad only the (tiny) targets; preds stream unpadded -- the edge block's
    # out-of-range rows are masked in-kernel via the global row index.
    tgt = target.astype(jnp.int32)
    tgt_p = tgt if n_pad == n else jnp.pad(tgt, (0, n_pad - n),
                                           constant_values=ignore_index)
    tgt_p = tgt_p.reshape(n_pad, 1)

    kernel = functools.partial(_ls_ce_partial_kernel, n_valid=n,
                               ignore_index=ignore_index)

    partials = pl.pallas_call(
        kernel,
        out_shape=jax.ShapeDtypeStruct((num_blocks, 1, 128), jnp.float32),
        grid_spec=pltpu.PrefetchScalarGridSpec(
            num_scalar_prefetch=0,
            grid=(num_blocks,),
            in_specs=[
                pl.BlockSpec((tile_n, c), lambda i: (i, 0)),   # preds row tile
                pl.BlockSpec((tile_n, 1), lambda i: (i, 0)),   # target row tile
            ],
            out_specs=pl.BlockSpec((1, 1, 128), lambda i: (i, 0, 0)),
        ),
        compiler_params=pltpu.CompilerParams(
            dimension_semantics=("parallel",),   # independent row blocks
            vmem_limit_bytes=int(vmem_budget)),
    )(preds, tgt_p)

    smooth_sum = jnp.sum(partials[:, 0, 0])
    nll_sum = jnp.sum(partials[:, 0, 1])
    smooth_mean = smooth_sum / jnp.float32(n)        # reduce_loss quirk: mean over batch
    return epsilon * (smooth_mean / jnp.float32(c)) + (1.0 - epsilon) * nll_sum


def _reference(preds, target, epsilon=EPSILON, ignore_index=IGNORE_INDEX):
    log_preds = jax.nn.log_softmax(preds.astype(jnp.float32), axis=-1)
    c = preds.shape[-1]
    smooth = jnp.mean(-jnp.sum(log_preds, axis=-1))
    valid = target != ignore_index
    picked = jnp.take_along_axis(
        log_preds, jnp.clip(target, 0, c - 1)[:, None], axis=-1)[:, 0]
    nll = jnp.sum(jnp.where(valid, -picked, 0.0))
    return epsilon * (smooth / c) + (1.0 - epsilon) * nll


if __name__ == "__main__":
    key = jax.random.PRNGKey(0)
    k1, k2, k3, k4, k5, k6 = jax.random.split(key, 6)

    # Case 1: small problem; megacore clamp splits it into 2 row blocks.
    N, C = 16, 32
    preds = jax.random.normal(k1, (N, C), dtype=jnp.float32)
    target = jax.random.randint(k2, (N,), 0, C, dtype=jnp.int32)
    target = target.at[3].set(IGNORE_INDEX).at[11].set(IGNORE_INDEX)
    out = jax.block_until_ready(label_smoothing_cross_entropy(preds, target))
    ref = _reference(preds, target)
    assert jnp.allclose(out, ref, rtol=1e-4, atol=1e-4), (out, ref)

    # Case 2: batch not a multiple of the tile (exercises the unpadded edge
    # block + row masking) with a tiny explicit tile budget -> 5 grid blocks.
    N2, C2 = 37, 24
    preds2 = jax.random.normal(k3, (N2, C2), dtype=jnp.float32)
    target2 = jax.random.randint(k4, (N2,), 0, C2, dtype=jnp.int32)
    target2 = target2.at[0].set(IGNORE_INDEX).at[30].set(IGNORE_INDEX)
    out2 = jax.block_until_ready(
        label_smoothing_cross_entropy(preds2, target2, tile_bytes=8 * C2 * 4))
    ref2 = _reference(preds2, target2)
    assert jnp.allclose(out2, ref2, rtol=1e-4, atol=1e-4), (out2, ref2)

    # Case 3: default byte-sized tiles, C not a multiple of 128, partial edge block.
    N3, C3 = 300, 144
    preds3 = jax.random.normal(k5, (N3, C3), dtype=jnp.float32)
    target3 = jax.random.randint(k6, (N3,), 0, C3, dtype=jnp.int32)
    target3 = target3.at[7].set(IGNORE_INDEX)
    out3 = jax.block_until_ready(label_smoothing_cross_entropy(preds3, target3))
    ref3 = _reference(preds3, target3)
    assert jnp.allclose(out3, ref3, rtol=1e-4, atol=1e-4), (out3, ref3)

    # Case 4: bf16 inputs exercise the packed native-dtype elementwise path
    # (f32 accumulation only); compared against an f32 reference with loose tol.
    preds4 = preds3.astype(jnp.bfloat16)
    out4 = jax.block_until_ready(label_smoothing_cross_entropy(preds4, target3))
    ref4 = _reference(preds4, target3)
    assert jnp.allclose(out4, ref4, rtol=2e-2, atol=0.5), (out4, ref4)

    print("KERNEL_OK")
</pallas_src>

<mosaic_0001>
module attributes {stable_mosaic.version = 11 : i64} {
  func.func @_ls_ce_partial_kernel(%arg0: i32, %arg1: memref<8x32xf32, #tpu.memory_space<vmem>>, %arg2: memref<8x1xi32, #tpu.memory_space<vmem>>, %arg3: memref<1x1x128xf32, #tpu.memory_space<vmem>>) attributes {dimension_semantics = [#tpu.dimension_semantics<parallel>], iteration_bounds = array<i64: 2>, scalar_prefetch = 0 : i64, scratch_operands = 0 : i64, tpu.core_type = #tpu.core_type<tc>, window_params = [{transform_indices = @transform_0, window_bounds = array<i64: 8, 32>}, {transform_indices = @transform_1, window_bounds = array<i64: 8, 1>}, {transform_indices = @transform_2, window_bounds = array<i64: 1, 1, 128>}]} {
    %c0 = arith.constant 0 : index
    %c0_0 = arith.constant 0 : index
    %0 = vector.load %arg1[%c0, %c0_0] : memref<8x32xf32, #tpu.memory_space<vmem>>, vector<8x32xf32>
    %cst = arith.constant dense<0xFF800000> : vector<8xf32>
    %1 = vector.multi_reduction <maximumf>, %0, %cst [1] : vector<8x32xf32> to vector<8xf32>
    %2 = vector.shape_cast %1 : vector<8xf32> to vector<8x1xf32>
    %3 = vector.broadcast %2 : vector<8x1xf32> to vector<8x32xf32>
    %4 = arith.subf %0, %3 : vector<8x32xf32>
    %5 = math.exp %4 : vector<8x32xf32>
    %cst_1 = arith.constant dense<0.000000e+00> : vector<8xf32>
    %6 = vector.multi_reduction <add>, %5, %cst_1 [1] : vector<8x32xf32> to vector<8xf32>
    %7 = vector.shape_cast %6 : vector<8xf32> to vector<8x1xf32>
    %8 = math.log %7 : vector<8x1xf32>
    %c8_i32 = arith.constant 8 : i32
    %9 = arith.muli %arg0, %c8_i32 : i32
    %10 = tpu.iota {dimensions = array<i32: 0>} : vector<8x1xi32>
    %11 = vector.broadcast %9 : i32 to vector<8x1xi32>
    %12 = arith.addi %11, %10 : vector<8x1xi32>
    %c16_i32 = arith.constant 16 : i32
    %13 = vector.broadcast %c16_i32 : i32 to vector<8x1xi32>
    %14 = arith.cmpi slt, %12, %13 : vector<8x1xi32>
    %cst_2 = arith.constant dense<0.000000e+00> : vector<8xf32>
    %15 = vector.multi_reduction <add>, %4, %cst_2 [1] : vector<8x32xf32> to vector<8xf32>
    %16 = vector.shape_cast %15 : vector<8xf32> to vector<8x1xf32>
    %cst_3 = arith.constant 3.200000e+01 : f32
    %17 = vector.broadcast %cst_3 : f32 to vector<8x1xf32>
    %18 = arith.mulf %17, %8 : vector<8x1xf32>
    %19 = arith.subf %18, %16 : vector<8x1xf32>
    %cst_4 = arith.constant 0.000000e+00 : f32
    %20 = vector.broadcast %cst_4 : f32 to vector<8x1xf32>
    %21 = arith.select %14, %19, %20 : vector<8x1xi1>, vector<8x1xf32>
    %c0_5 = arith.constant 0 : index
    %c0_6 = arith.constant 0 : index
    %22 = vector.load %arg2[%c0_5, %c0_6] : memref<8x1xi32, #tpu.memory_space<vmem>>, vector<8x1xi32>
    %23 = tpu.iota {dimensions = array<i32: 1>} : vector<8x32xi32>
    %24 = vector.broadcast %22 : vector<8x1xi32> to vector<8x32xi32>
    %25 = arith.cmpi eq, %23, %24 : vector<8x32xi32>
    %cst_7 = arith.constant 0.000000e+00 : f32
    %26 = vector.broadcast %cst_7 : f32 to vector<8x32xf32>
    %27 = arith.select %25, %4, %26 : vector<8x32xi1>, vector<8x32xf32>
    %cst_8 = arith.constant dense<0.000000e+00> : vector<8xf32>
    %28 = vector.multi_reduction <add>, %27, %cst_8 [1] : vector<8x32xf32> to vector<8xf32>
    %29 = vector.shape_cast %28 : vector<8xf32> to vector<8x1xf32>
    %c-100_i32 = arith.constant -100 : i32
    %30 = vector.broadcast %c-100_i32 : i32 to vector<8x1xi32>
    %31 = arith.cmpi ne, %22, %30 : vector<8x1xi32>
    %32 = arith.andi %14, %31 : vector<8x1xi1>
    %33 = arith.subf %8, %29 : vector<8x1xf32>
    %cst_9 = arith.constant 0.000000e+00 : f32
    %34 = vector.broadcast %cst_9 : f32 to vector<8x1xf32>
    %35 = arith.select %32, %33, %34 : vector<8x1xi1>, vector<8x1xf32>
    %36 = vector.shape_cast %21 : vector<8x1xf32> to vector<1x8x1xf32>
    %cst_10 = arith.constant dense<0.000000e+00> : vector<1xf32>
    %37 = vector.multi_reduction <add>, %36, %cst_10 [1, 2] : vector<1x8x1xf32> to vector<1xf32>
    %38 = vector.shape_cast %37 : vector<1xf32> to vector<1x1x1xf32>
    %39 = vector.extract %38[0, 0, 0] : f32 from vector<1x1x1xf32>
    %40 = vector.shape_cast %35 : vector<8x1xf32> to vector<1x8x1xf32>
    %cst_11 = arith.constant dense<0.000000e+00> : vector<1xf32>
    %41 = vector.multi_reduction <add>, %40, %cst_11 [1, 2] : vector<1x8x1xf32> to vector<1xf32>
    %42 = vector.shape_cast %41 : vector<1xf32> to vector<1x1x1xf32>
    %43 = vector.extract %42[0, 0, 0] : f32 from vector<1x1x1xf32>
    %44 = tpu.iota {dimensions = array<i32: 1>} : vector<1x128xi32>
    %c0_i32 = arith.constant 0 : i32
    %45 = vector.broadcast %c0_i32 : i32 to vector<1x128xi32>
    %46 = arith.cmpi eq, %44, %45 : vector<1x128xi32>
    %cst_12 = arith.constant 0.000000e+00 : f32
    %47 = vector.broadcast %39 : f32 to vector<1x128xf32>
    %48 = vector.broadcast %cst_12 : f32 to vector<1x128xf32>
    %49 = arith.select %46, %47, %48 : vector<1x128xi1>, vector<1x128xf32>
    %c1_i32 = arith.constant 1 : i32
    %50 = vector.broadcast %c1_i32 : i32 to vector<1x128xi32>
    %51 = arith.cmpi eq, %44, %50 : vector<1x128xi32>
    %cst_13 = arith.constant 0.000000e+00 : f32
    %52 = vector.broadcast %43 : f32 to vector<1x128xf32>
    %53 = vector.broadcast %cst_13 : f32 to vector<1x128xf32>
    %54 = arith.select %51, %52, %53 : vector<1x128xi1>, vector<1x128xf32>
    %55 = arith.addf %49, %54 : vector<1x128xf32>
    %c0_14 = arith.constant 0 : index
    %c0_15 = arith.constant 0 : index
    %c0_16 = arith.constant 0 : index
    %56 = vector.load %arg3[%c0_14, %c0_15, %c0_16] : memref<1x1x128xf32, #tpu.memory_space<vmem>>, vector<1x1x128xf32>
    %57 = vector.shape_cast %56 : vector<1x1x128xf32> to vector<1x128xf32>
    %58 = vector.shape_cast %55 : vector<1x128xf32> to vector<1x1x128xf32>
    tpu.vector_store %arg3[%c0_14, %c0_15, %c0_16], %58 {strides = array<i32>} : memref<1x1x128xf32, #tpu.memory_space<vmem>>, vector<1x1x128xf32>,
    return
  }
  func.func @transform_0(%arg0: i32) -> (i32, i32) {
    %c0_i32 = arith.constant 0 : i32
    %c0_i32_0 = arith.constant 0 : i32
    return %arg0, %c0_i32 : i32, i32
  }
  func.func @transform_1(%arg0: i32) -> (i32, i32) {
    %c0_i32 = arith.constant 0 : i32
    %c0_i32_0 = arith.constant 0 : i32
    return %arg0, %c0_i32 : i32, i32
  }
  func.func @transform_2(%arg0: i32) -> (i32, i32, i32) {
    %c0_i32 = arith.constant 0 : i32
    %c0_i32_0 = arith.constant 0 : i32
    %c0_i32_1 = arith.constant 0 : i32
    return %arg0, %c0_i32, %c0_i32_0 : i32, i32, i32
  }
}

</mosaic_0001>

<bundles_post_ra>
// kernel: tpu_custom_call.1
= control target key start
LH: loop header
LB: loop body
LE: loop exit
PB: predicated region body
PF: predicated region fallthrough
CT: control target
= control target key end

     0   :  { %7 = vsyncpa [#allocation3], 0  ;;  %s552_s0 = inlined_call_operand.vmem [shape: f32[16,32], index: 0, kind: input, shape index: {}]   ;;  %s553_s1 = inlined_call_operand.vmem [shape: s32[16,1], index: 1, kind: input, shape index: {}]   ;;  %s554_s2 = inlined_call_operand.hbm [shape: f32[2,1,128], index: 2, kind: output, shape index: {}]  }
   0x1   :  { %9 = vsyncpa [#allocation3 + $0x1], 0  ;;  %s444_s9 = smov 0   ;;  %s446_s10 = smov 0  }
   0x2   :  { %s448_s11 = smov 0   ;;  %s450_s12 = smov 0  }
   0x3 LB: > { %s465_s13 = sadd.s32 4294967295, %s425_s12   ;;  %s304_s14 = sadd.s32 4294967294, %s425_s12   ;;  %s425_s12 = sphi %s450_s12, %s560_s12   ;;  %s421_s11 = sphi %s448_s11, %s559_s11   ;;  %s417_s10 = sphi %s446_s10, %s558_s10   ;;  %s413_s9 = sphi %s444_s9, %s557_s9  }
   0x4   : > { %s469_s15 = sadd.s32 1, %s425_s12   ;;  %s74_s16 = sadd.s32 1, %s421_s11 }
   0x5   : > { %s71_s17 = ssub.s32 %s425_s12, %s469_s15  ;;  %p84_p0 = scmp.ne.s32.totalorder %s421_s11, %s417_s10 }
   0x6   : > { %p72_p1 = scmp.eq.s32.totalorder %s71_s17, 0  ;;  %p85_p2 = scmp.eq.s32.totalorder %s465_s13, 1 }
   0x7   : > { %p90_p3 = scmp.ne.s32.totalorder %s417_s10, %s413_s9  ;;  %p91_p4 = scmp.eq.s32.totalorder %s304_s14, 1 }
   0x8   : > { %s480_s18 = scalar_select %p72_p1, %s421_s11, %s74_s16  }
   0x9   : > { %p482_p5 = por %p85_p2, %p84_p0  ;;  %p486_p6 = por %p91_p4, %p90_p3 }
   0xa   : > { %p307_p7 = scmp.ge.s32.totalorder %s425_s12, 1  ;;  %p123_p8 = scmp.lt.s32.totalorder %s425_s12, 3 }
   0xc   : > { %p124_p9 = pnand %p307_p7, %p123_p8 }
   0xd   : > { %p147_p10 = scmp.lt.s32.totalorder (!%p124_p9), %s465_s13, 1  ;;  %v427_v0 = vmov (!%p124_p9), 0   ;;  %vm156_vm0 = vcmask (!%p124_p9), 261120   ;;  %v169_v7 = vlaneseq (!%p124_p9)  ;;  %s310_s29 = sshll.u32 (!%p124_p9), %s465_s13, 3  ;;  %vm195_vm5 = vcmask (!%p124_p9), 7168  }
   0xe   : > { %127 = sbr.rel (%p124_p9) target bundleno = 572 (0x23c), region = 28  ;;  %358 = vset.pattern.permute.xlu0 (!%p124_p9), %v427_v0  ;;  %v171_v17 = vstv (!%p124_p9), %s310_s29  ;;  %s145_s30 = sand.u32 (!%p124_p9), 1, %s417_s10  }
   0xf   : > { %v182_v8 = vand.u32 (!%p124_p9), 127, %v169_v7  ;;  %v170_v16 = vshrl.u32 (!%p124_p9), %v169_v7, 7  ;;  %s311_s4 = sshll.u32 (!%p124_p9), %s465_s13, 4  ;;  %s146_s6 = scalar_lea.vmem (!%p124_p9), [#allocation2], %s145_s30 }
  0x10   : > { %s237_s7 = sshll.u32 (!%p124_p9), %s146_s6, 4  ;;  %s510_s16 = scalar_lea.hbm (!%p124_p9), %s554_s2, %s311_s4  ;;  %s512_s7 = int_to_ptr.vmem [resolvable:$true] %s237_s7 }
  0x11   : > { %v172_v19 = vadd.s32 (!%p124_p9), %v171_v17, %v170_v16  ;;  %vm216_vm6 = vcmp.eq.s32.totalorder (!%p124_p9), %v182_v8, 0  ;;  %vm219_vm7 = vcmp.eq.s32.totalorder (!%p124_p9), %v182_v8, 1  ;;  %s225_s17 = scalar_lea.sflag (!%p124_p9), [#allocation3], %s145_s30 }
  0x13   : > { %vm173_vm3 = vcmp.lt.s32.totalorder (!%p124_p9), %v172_v19, 16 }
  0x15   : > { %s148_s21 = scalar_select %p147_p10, %s465_s13, 1 }
  0x16   : > { %s363_s13 = scalar_lea.vmem %s512_s7, 16 }
  0x17   : > { %s308_s22 = sshll.u32 %s148_s21, 3  ;;  %p364_p11 = scmp.ne.s32.totalorder %s512_s7, %s363_s13 }
  0x18   : > { %s150_s25 = scalar_lea.vmem %s552_s0, %s308_s22  ;;  %s154_s28 = scalar_lea.vmem %s553_s1, %s308_s22 }
  0x19   : > { %v155_v1 = vld [vmem:[%s150_s25] sm:$0xff]  ;;  %p365_p12 = pnand %p364_p11, %p482_p5  ;;  %s428_s21 = smov [#allocation2]  }
  0x1a   : > { %v157_v2 = vsel %vm156_vm0, %v155_v1, -inf  ;;  %v180_v3 = vld [vmem:[%s154_s28] sm:$0xff]  ;;  %s367_s22 = sshll.u32 %s428_s21, 4  ;;  %s368_s22 = int_to_ptr.vmem [resolvable:$false] %s367_s22 }
  0x1b   : > { %158 = vmax.xlane.f32.xlu0 %v157_v2  ;;  %vm191_vm2 = vcmp.ne.s32.totalorder %v180_v3, 4294967196  ;;  %p366_p13 = pneg %p365_p12  ;;  %s369_s23 = scalar_lea.vmem %s368_s22, 32 }
  0x1c   : > { %vm192_vm4 = vmand %vm173_vm3, %vm191_vm2  ;;  %p370_p0 = scmp.lt.s32.totalorder %s512_s7, %s368_s22  ;;  %p371_p1 = scmp.lt.s32.totalorder %s369_s23, %s363_s13 }
  0x1e   : > { %p372_p2 = por %p371_p1, %p370_p0 }
  0x20   : > { %p373_p3 = pnand %p372_p2, %p366_p13 }
  0x31   : > { %184 = vperm.xlu0 %358, %v180_v3  }
  0xa8   : > { %v159_v4 = vpop.xlane.xlu0 %158 }
  0xa9   : > { %v160_v5 = vsub.f32 %v155_v1, %v159_v4 }
  0xab   : > { %v161_v6 = vmul.f32 1.442695, %v160_v5  ;;  %v174_v12 = vsel %vm156_vm0, %v160_v5, 0.0 }
  0xad   : > { %359 = vpow2.f32 %v161_v6 }
  0xb0   : > { %v185_v10 = vpop.permute.xlu0 %184 }
  0xb1   : > { %vm186_vm1 = vcmp.eq.s32.totalorder %v182_v8, %v185_v10 }
  0xb2   : > { %v187_v13 = vsel %vm186_vm1, %v160_v5, 0.0 }
  0xb3   : > { %v188_v14 = vsel %vm156_vm0, %v187_v13, 0.0 }
  0xb7   : > { %v360_v9 = vpop.eup %359 }
  0xb8   : > { %v163_v11 = vsel %vm156_vm0, %v360_v9, 0.0 }
  0xb9   : > { %164 = vadd.xlane.f32.xlu1 %v163_v11 }
  0xbd   : > { %175 = vadd.xlane.f32.xlu1 %v174_v12 }
  0xc1   : > { %189 = vadd.xlane.f32.xlu1 %v188_v14 }
 0x146   : > { %v165_v15 = vpop.xlane.xlu1 %164 }
 0x147   : > { %361 = vlog2.f32 %v165_v15 }
 0x14a   : > { %v176_v18 = vpop.xlane.xlu1 %175 }
 0x14e   : > { %v190_v23 = vpop.xlane.xlu1 %189 }
 0x151   : > { %v362_v20 = vpop.eup %361 }
 0x152   : > { %v167_v21 = vmul.f32 0.6931472, %v362_v20 }
 0x154   : > { %v177_v22 = vmul.f32 32.0, %v167_v21  ;;  %v193_v25 = vsub.f32 %v167_v21, %v190_v23 }
 0x156   : > { %v178_v24 = vsub.f32 %v177_v22, %v176_v18  ;;  %v194_v28 = vsel %vm192_vm4, %v193_v25, 0.0 }
 0x157   : > { %v206_v29 = vsel %vm195_vm5, %v194_v28, 0.0 }
 0x158   : > { %v179_v26 = vsel %vm173_vm3, %v178_v24, 0.0 }
 0x159   : > { %v196_v27 = vsel %vm195_vm5, %v179_v26, 0.0 }
 0x15a   : > { %197 = vadd.xlane.f32.xlu1 %v196_v27 }
 0x15e   : > { %207 = vadd.xlane.f32.xlu1 %v206_v29 }
 0x1e7   : > { %v198_v30 = vpop.xlane.xlu1 %197 }
 0x1e8   : > { %v199_v31 = vrot.slane %v198_v30, 4 }
 0x1ea   : > { %v200_v32 = vadd.f32 %v199_v31, %v198_v30 }
 0x1eb   : > { %v208_v33 = vpop.xlane.xlu1 %207 }
 0x1ec   : > { %v201_v34 = vrot.slane %v200_v32, 2  ;;  %v209_v35 = vrot.slane %v208_v33, 4 }
 0x1ee   : > { %v210_v36 = vadd.f32 %v209_v35, %v208_v33  ;;  %v202_v37 = vadd.f32 %v201_v34, %v200_v32 }
 0x1f0   : > { %v211_v38 = vrot.slane %v210_v36, 2  ;;  %v203_v39 = vrot.slane %v202_v37, 1 }
 0x1f2   : > { %v212_v40 = vadd.f32 %v211_v38, %v210_v36  ;;  %v204_v41 = vadd.f32 %v203_v39, %v202_v37 }
 0x1f4   : > { %314 = vpush %v204_v41  ;;  %v213_v42 = vrot.slane %v212_v40, 1 }
 0x1f6   : > { %v214_v43 = vadd.f32 %v213_v42, %v212_v40 }
 0x1f8   : > { %316 = vpush %v214_v43 }
 0x225   : > { %s315_s3 = spop %314 }
 0x226   : > { %v217_v44 = vstv %s315_s3 }
 0x227   : > { %v218_v46 = vsel %vm216_vm6, %v217_v44, 0.0 }
 0x229   : > { %s317_s5 = spop %316 }
 0x22a   : > { %v220_v45 = vstv %s317_s5 }
 0x22b   : > { %v221_v47 = vsel %vm219_vm7, %v220_v45, 0.0 }
 0x22c   : > { %v222_v48 = vadd.f32 %v221_v47, %v218_v46 }
 0x22e   : > { %223 = vst [vmem:[%s146_s6] sm:$0x1] %v222_v48 }
 0x22f   : > { %376 = shalt.err (!%p373_p3)
}
 0x230   : > { %s377_s24 = scalar_lea.hbm %s510_s16, 16  ;;  %s381_s27 = scalar_lea.hbm %s554_s2, 32 }
 0x231   : > { %p378_p4 = scmp.ne.s32.totalorder %s510_s16, %s377_s24  ;;  %p382_p9 = scmp.lt.u32.totalorder %s510_s16, %s554_s2 }
 0x232   : > { %p383_p10 = scmp.lt.u32.totalorder %s381_s27, %s377_s24  ;;  %p385_p12 = scmp.lt.u32.totalorder %s377_s24, %s510_s16 }
 0x233   : > { %p379_p7 = pnand %p378_p4, %p482_p5 }
 0x234   : > { %p384_p11 = por %p383_p10, %p382_p9 }
 0x235   : > { %p380_p8 = pneg %p379_p7 }
 0x236   : > { %p386_p13 = por %p385_p12, %p384_p11 }
 0x238   : > { %p387_p0 = pnand %p386_p13, %p380_p8 }
 0x23a   : > { %390 = shalt.err (!%p387_p0)
}
 0x23b   : > { %318 = dma.vmem_to_hbm [thread:$0]  (%p482_p5), %s512_s7, 16, %s510_s16, %s225_s17  }
 0x23c PF: > { %p324_p1 = scmp.ge.s32.totalorder %s425_s12, 2  ;;  %s249_s30 = sand.u32 1, %s413_s9  }
 0x23d   : > { %s250_s3 = scalar_lea.sflag [#allocation3], %s249_s30 }
 0x23e   : > { %p321_p2 = pnand %p324_p1, %p486_p6 }
 0x240   : > { %408 = dma.done.wait (!%p321_p2), %s250_s3, 16  }
 0x241   : > { %410 = vsyncadd (!%p321_p2), %s250_s3, 4294967280  ;;  %p12_p3 = scmp.ge.s32.totalorder %s469_s15, 4   ;;  %s557_s9 = smov %s417_s10 }
 0x242   : > { %s558_s10 = smov %s421_s11  ;;  %s559_s11 = smov %s480_s18 }
 0x243   : > { %s560_s12 = smov %s469_s15  ;;  %14 = sbr.rel (!%p12_p3) target bundleno = 3 (0x3), region = 66 }
 0x24a   :  { %254 = vsyncpa [#allocation3], 1 }
 0x24b   :  { %256 = vsyncpa [#allocation3 + $0x1], 1 }

</bundles_post_ra>
